<compile_context>
chip_gen: v7x
topology: tpu7x:2x2x1
jax: 0.10.0
libtpu: 0.0.40
codegen_flags: <defaults>
</compile_context>

<pallas_src>
import math

import numpy as np
import jax
import jax.numpy as jnp
from jax.experimental import pallas as pl
from jax.experimental.pallas import tpu as pltpu


# ----------------------------------------------------------------------------
# Pallas kernel: full CALayer forward for a (TB, C, HW) block of samples.
# ----------------------------------------------------------------------------
def _ca_layer_kernel(x_ref, w1_ref, b1_ref, w2_ref, b2_ref, o_ref):
    x = x_ref[...]                                        # (TB, C, HW) f32

    # AdaptiveAvgPool2d(1): the 1/HW scale is folded into w1, so a lane-sum
    # (XLU) is all that's needed here.
    pooled = jnp.sum(x, axis=-1)                          # (TB, C)

    # Conv2d(C, C//r, 1) + ReLU  -> channel matmul on the MXU.
    h = jnp.dot(pooled, w1_ref[...],
                preferred_element_type=jnp.float32) + b1_ref[...]
    h = jnp.maximum(h, 0.0)                               # (TB, mid)

    # Conv2d(C//r, C, 1) + Sigmoid.
    s = jnp.dot(h, w2_ref[...],
                preferred_element_type=jnp.float32) + b2_ref[...]
    s = jax.nn.sigmoid(s)                                 # (TB, C)

    # x * y : broadcast per-(sample, channel) scale over all spatial lanes.
    o_ref[...] = (x * s[:, :, None]).astype(o_ref.dtype)


# ----------------------------------------------------------------------------
# Wrapper: layout, batching (TB samples per grid step), pallas_call.
# ----------------------------------------------------------------------------
def ca_layer(x, w1, b1, w2, b2, *, block_batch=None):
    """CALayer forward.  x: (B, C, H, W) f32; weights stored [in, out]."""
    B, C, H, W = x.shape
    HW = H * W
    mid = w1.shape[1]

    # Lane-dense layout: HW (multiple of 128 here) is the fast lane axis.
    x2 = x.reshape(B, C, HW)

    # Fold the 1/HW pooling scale into the first conv weight (exact: the op is
    # linear before the ReLU).  Tiny (C, mid) op, fused by XLA.
    w1_scaled = w1 * (1.0 / HW)

    # --- choose samples per grid step (TB) ----------------------------------
    sample_bytes = C * HW * x.dtype.itemsize
    if block_batch is None:
        tb = max(1, (2 << 20) // sample_bytes)   # ~2 MiB input block / step
        if B >= 2:
            tb = min(tb, pl.cdiv(B, 2))          # keep >= 2 steps (2 TCs on v7x)
        tb = min(tb, B)
        if tb >= 8:
            tb = (tb // 8) * 8                   # nicer f32 sublane packing
    else:
        tb = max(1, min(block_batch, B))

    n_steps = pl.cdiv(B, tb)
    Bp = n_steps * tb
    if Bp != B:                                  # pad batch; padded rows are
        x2 = jnp.pad(x2, ((0, Bp - B), (0, 0), (0, 0)))  # sliced off below.

    cost = pl.CostEstimate(
        flops=4 * Bp * C * mid,                  # two tiny channel matmuls
        transcendentals=Bp * C,                  # sigmoid
        bytes_accessed=2 * Bp * C * HW * x.dtype.itemsize,
    )

    out = pl.pallas_call(
        _ca_layer_kernel,
        out_shape=jax.ShapeDtypeStruct((Bp, C, HW), x.dtype),
        grid_spec=pltpu.PrefetchScalarGridSpec(
            num_scalar_prefetch=0,
            grid=(n_steps,),
            in_specs=[
                pl.BlockSpec((tb, C, HW), lambda b: (b, 0, 0)),  # x block
                pl.BlockSpec((C, mid),    lambda b: (0, 0)),     # conv1 weight
                pl.BlockSpec((1, mid),    lambda b: (0, 0)),     # conv1 bias
                pl.BlockSpec((mid, C),    lambda b: (0, 0)),     # conv2 weight
                pl.BlockSpec((1, C),      lambda b: (0, 0)),     # conv2 bias
            ],
            out_specs=pl.BlockSpec((tb, C, HW), lambda b: (b, 0, 0)),
        ),
        compiler_params=pltpu.CompilerParams(
            dimension_semantics=("parallel",),   # batch steps -> 2 TCs on v7x
        ),
        cost_estimate=cost,
    )(x2, w1_scaled, b1, w2, b2)

    if Bp != B:
        out = out[:B]
    return out.reshape(B, C, H, W)


# ----------------------------------------------------------------------------
# Pure-JAX reference (same math as the torch module) for verification.
# ----------------------------------------------------------------------------
def ca_layer_ref(x, w1, b1, w2, b2):
    y = jnp.mean(x, axis=(2, 3))                       # (B, C) global avg pool
    h = jnp.maximum(y @ w1 + b1, 0.0)                  # conv1 (1x1) + ReLU
    s = jax.nn.sigmoid(h @ w2 + b2)                    # conv2 (1x1) + Sigmoid
    return x * s[:, :, None, None]                     # channel rescale


# ----------------------------------------------------------------------------
# Deterministic parameter init (shapes from CALayer.__init__).
# ----------------------------------------------------------------------------
def init_params(key, channel, reduction=16):
    mid = channel // reduction
    k1, k2, k3, k4 = jax.random.split(key, 4)
    s1 = 1.0 / math.sqrt(channel)   # fan_in of conv1
    s2 = 1.0 / math.sqrt(mid)       # fan_in of conv2
    # Weights stored [in_features, out_features] (transposed vs torch Conv2d).
    w1 = s1 * jax.random.normal(k1, (channel, mid), jnp.float32)
    b1 = s1 * jax.random.normal(k2, (1, mid), jnp.float32)
    w2 = s2 * jax.random.normal(k3, (mid, channel), jnp.float32)
    b2 = s2 * jax.random.normal(k4, (1, channel), jnp.float32)
    return w1, b1, w2, b2


# ----------------------------------------------------------------------------
if __name__ == "__main__":
    C, H, W = 64, 16, 16            # reduction=16 needs C >= 16
    REDUCTION = 16

    root = jax.random.PRNGKey(0)
    k_params, k_x1, k_x2 = jax.random.split(root, 3)
    w1, b1, w2, b2 = init_params(k_params, C, REDUCTION)

    # Test 1: small batch (TB=1, grid=2 — multi-step path).
    x_a = jax.random.normal(k_x1, (2, C, H, W), jnp.float32)
    out_a = ca_layer(x_a, w1, b1, w2, b2)
    jax.block_until_ready(out_a)
    np.testing.assert_allclose(np.asarray(out_a),
                               np.asarray(ca_layer_ref(x_a, w1, b1, w2, b2)),
                               rtol=1e-5, atol=1e-5)

    # Test 2: odd batch exercising TB>1 plus batch padding.
    x_b = jax.random.normal(k_x2, (13, C, H, W), jnp.float32)
    out_b = ca_layer(x_b, w1, b1, w2, b2)
    jax.block_until_ready(out_b)
    np.testing.assert_allclose(np.asarray(out_b),
                               np.asarray(ca_layer_ref(x_b, w1, b1, w2, b2)),
                               rtol=1e-5, atol=1e-5)

    print("KERNEL_OK")
</pallas_src>

<mosaic_0001>
module attributes {stable_mosaic.version = 11 : i64} {
  func.func @_ca_layer_kernel(%arg0: i32, %arg1: memref<1x64x256xf32, #tpu.memory_space<vmem>>, %arg2: memref<64x4xf32, #tpu.memory_space<vmem>>, %arg3: memref<1x4xf32, #tpu.memory_space<vmem>>, %arg4: memref<4x64xf32, #tpu.memory_space<vmem>>, %arg5: memref<1x64xf32, #tpu.memory_space<vmem>>, %arg6: memref<1x64x256xf32, #tpu.memory_space<vmem>>) attributes {dimension_semantics = [#tpu.dimension_semantics<parallel>], iteration_bounds = array<i64: 2>, scalar_prefetch = 0 : i64, scratch_operands = 0 : i64, tpu.core_type = #tpu.core_type<tc>, window_params = [{transform_indices = @transform_0, window_bounds = array<i64: 1, 64, 256>}, {pipeline_mode = #tpu.pipeline_mode<synchronous>, transform_indices = @transform_1, window_bounds = array<i64: 64, 4>}, {pipeline_mode = #tpu.pipeline_mode<synchronous>, transform_indices = @transform_2, window_bounds = array<i64: 1, 4>}, {pipeline_mode = #tpu.pipeline_mode<synchronous>, transform_indices = @transform_3, window_bounds = array<i64: 4, 64>}, {pipeline_mode = #tpu.pipeline_mode<synchronous>, transform_indices = @transform_4, window_bounds = array<i64: 1, 64>}, {transform_indices = @transform_5, window_bounds = array<i64: 1, 64, 256>}]} {
    %c0 = arith.constant 0 : index
    %c0_0 = arith.constant 0 : index
    %c0_1 = arith.constant 0 : index
    %0 = vector.load %arg1[%c0, %c0_0, %c0_1] : memref<1x64x256xf32, #tpu.memory_space<vmem>>, vector<1x64x256xf32>
    %cst = arith.constant dense<0.000000e+00> : vector<1x64xf32>
    %1 = vector.multi_reduction <add>, %0, %cst [2] : vector<1x64x256xf32> to vector<1x64xf32>
    %c0_2 = arith.constant 0 : index
    %c0_3 = arith.constant 0 : index
    %2 = vector.load %arg2[%c0_2, %c0_3] : memref<64x4xf32, #tpu.memory_space<vmem>>, vector<64x4xf32>
    %cst_4 = arith.constant dense<0.000000e+00> : vector<1x4xf32>
    %3 = tpu.matmul %1, %2, %cst_4 {dimension_numbers = #tpu.dot_dimension_numbers<[1], [0], [0], [1], [0, 0, 1, 1], [], []>} : vector<1x64xf32>, vector<64x4xf32>, vector<1x4xf32> -> vector<1x4xf32>
    %c0_5 = arith.constant 0 : index
    %c0_6 = arith.constant 0 : index
    %4 = vector.load %arg3[%c0_5, %c0_6] : memref<1x4xf32, #tpu.memory_space<vmem>>, vector<1x4xf32>
    %5 = arith.addf %3, %4 : vector<1x4xf32>
    %cst_7 = arith.constant 0.000000e+00 : f32
    %6 = vector.broadcast %cst_7 : f32 to vector<1x4xf32>
    %7 = arith.maximumf %5, %6 : vector<1x4xf32>
    %c0_8 = arith.constant 0 : index
    %c0_9 = arith.constant 0 : index
    %8 = vector.load %arg4[%c0_8, %c0_9] : memref<4x64xf32, #tpu.memory_space<vmem>>, vector<4x64xf32>
    %cst_10 = arith.constant dense<0.000000e+00> : vector<1x64xf32>
    %9 = tpu.matmul %7, %8, %cst_10 {dimension_numbers = #tpu.dot_dimension_numbers<[1], [0], [0], [1], [0, 0, 1, 1], [], []>} : vector<1x4xf32>, vector<4x64xf32>, vector<1x64xf32> -> vector<1x64xf32>
    %c0_11 = arith.constant 0 : index
    %c0_12 = arith.constant 0 : index
    %10 = vector.load %arg5[%c0_11, %c0_12] : memref<1x64xf32, #tpu.memory_space<vmem>>, vector<1x64xf32>
    %11 = arith.addf %9, %10 : vector<1x64xf32>
    %12 = arith.negf %11 : vector<1x64xf32>
    %13 = math.exp %12 : vector<1x64xf32>
    %cst_13 = arith.constant 1.000000e+00 : f32
    %14 = vector.broadcast %cst_13 : f32 to vector<1x64xf32>
    %15 = arith.addf %14, %13 : vector<1x64xf32>
    %16 = arith.divf %14, %15 : vector<1x64xf32>
    %17 = vector.shape_cast %16 : vector<1x64xf32> to vector<1x64x1xf32>
    %18 = vector.broadcast %17 : vector<1x64x1xf32> to vector<1x64x256xf32>
    %19 = arith.mulf %0, %18 : vector<1x64x256xf32>
    %c0_14 = arith.constant 0 : index
    %c0_15 = arith.constant 0 : index
    %c0_16 = arith.constant 0 : index
    %20 = vector.load %arg6[%c0_14, %c0_15, %c0_16] : memref<1x64x256xf32, #tpu.memory_space<vmem>>, vector<1x64x256xf32>
    tpu.vector_store %arg6[%c0_14, %c0_15, %c0_16], %19 {strides = array<i32>} : memref<1x64x256xf32, #tpu.memory_space<vmem>>, vector<1x64x256xf32>,
    return
  }
  func.func @transform_0(%arg0: i32) -> (i32, i32, i32) {
    %c0_i32 = arith.constant 0 : i32
    %c0_i32_0 = arith.constant 0 : i32
    %c0_i32_1 = arith.constant 0 : i32
    return %arg0, %c0_i32, %c0_i32_0 : i32, i32, i32
  }
  func.func @transform_1(%arg0: i32) -> (i32, i32) {
    %c0_i32 = arith.constant 0 : i32
    %c0_i32_0 = arith.constant 0 : i32
    %c0_i32_1 = arith.constant 0 : i32
    return %c0_i32, %c0_i32_0 : i32, i32
  }
  func.func @transform_2(%arg0: i32) -> (i32, i32) {
    %c0_i32 = arith.constant 0 : i32
    %c0_i32_0 = arith.constant 0 : i32
    %c0_i32_1 = arith.constant 0 : i32
    return %c0_i32, %c0_i32_0 : i32, i32
  }
  func.func @transform_3(%arg0: i32) -> (i32, i32) {
    %c0_i32 = arith.constant 0 : i32
    %c0_i32_0 = arith.constant 0 : i32
    %c0_i32_1 = arith.constant 0 : i32
    return %c0_i32, %c0_i32_0 : i32, i32
  }
  func.func @transform_4(%arg0: i32) -> (i32, i32) {
    %c0_i32 = arith.constant 0 : i32
    %c0_i32_0 = arith.constant 0 : i32
    %c0_i32_1 = arith.constant 0 : i32
    return %c0_i32, %c0_i32_0 : i32, i32
  }
  func.func @transform_5(%arg0: i32) -> (i32, i32, i32) {
    %c0_i32 = arith.constant 0 : i32
    %c0_i32_0 = arith.constant 0 : i32
    %c0_i32_1 = arith.constant 0 : i32
    return %arg0, %c0_i32, %c0_i32_0 : i32, i32, i32
  }
}

</mosaic_0001>

<bundles_post_ra>
// kernel: tpu_custom_call.1
= control target key start
LH: loop header
LB: loop body
LE: loop exit
PB: predicated region body
PF: predicated region fallthrough
CT: control target
= control target key end

     0   :  { %10 = vsyncpa [#allocation3], 0  ;;  %s1223_s0 = inlined_call_operand.hbm [shape: f32[2,64,256], index: 0, kind: input, shape index: {}]   ;;  %s1224_s1 = inlined_call_operand.vmem [shape: f32[64,4], index: 1, kind: input, shape index: {}]   ;;  %s1225_s2 = inlined_call_operand.vmem [shape: f32[1,4], index: 2, kind: input, shape index: {}]   ;;  %s1226_s3 = inlined_call_operand.vmem [shape: f32[4,64], index: 3, kind: input, shape index: {}]   ;;  %s1227_s4 = inlined_call_operand.vmem [shape: f32[1,64], index: 4, kind: input, shape index: {}]   ;;  %s1228_s5 = inlined_call_operand.hbm [shape: f32[2,64,256], index: 5, kind: output, shape index: {}]  }
   0x1   :  { %12 = vsyncpa [#allocation3 + $0x1], 0 }
   0x2   :  { %13 = vsyncpa [#allocation4], 0 }
   0x3   :  { %15 = vsyncpa [#allocation4 + $0x1], 0  ;;  %s930_s18 = smov 0   ;;  %s932_s19 = smov 0  }
   0x4   :  { %s934_s20 = smov 0   ;;  %s936_s21 = smov 0  }
   0x5 LB: > { %s951_s22 = sadd.s32 4294967295, %s889_s21   ;;  %s669_s23 = sadd.s32 4294967294, %s889_s21   ;;  %s889_s21 = sphi %s936_s21, %s1241_s21   ;;  %s885_s20 = sphi %s934_s20, %s1240_s20   ;;  %s881_s19 = sphi %s932_s19, %s1239_s19   ;;  %s877_s18 = sphi %s930_s18, %s1238_s18  }
   0x6   : > { %s955_s24 = sadd.s32 1, %s889_s21   ;;  %s28_s25 = sadd.s32 1, %s885_s20 }
   0x7   : > { %s25_s26 = ssub.s32 %s889_s21, %s955_s24  ;;  %p35_p0 = scmp.ne.s32.totalorder %s885_s20, %s881_s19 }
   0x8   : > { %p26_p1 = scmp.eq.s32.totalorder %s25_s26, 0  ;;  %p36_p2 = scmp.eq.s32.totalorder %s889_s21, 0 }
   0x9   : > { %p41_p3 = scmp.ne.s32.totalorder %s881_s19, %s877_s18  ;;  %p42_p4 = scmp.eq.s32.totalorder %s951_s22, 0 }
   0xa   : > { %s967_s27 = scalar_select %p26_p1, %s885_s20, %s28_s25  }
   0xb   : > { %p969_p5 = por %p36_p2, %p35_p0  ;;  %p973_p6 = por %p42_p4, %p41_p3 }
   0xc   : > { %p149_p7 = scmp.eq.s32.totalorder %s951_s22, 1  ;;  %p155_p8 = scmp.eq.s32.totalorder %s669_s23, 1 }
   0xd   : > { %p748_p10 = scmp.lt.s32.totalorder %s889_s21, 2  ;;  %s187_s7 = sand.u32 1, %s885_s20  }
   0xe   : > { %p980_p11 = por %p149_p7, %p35_p0  ;;  %p984_p12 = por %p155_p8, %p41_p3 }
   0xf   : > { %s687_s8 = sshll.u32 %s889_s21, 11  ;;  %s672_s9 = sshll.u32 %s187_s7, 7 }
  0x10   : > { %s1232_s30 = scalar_select %p980_p11, 1, 0 }
  0x11   : > { %s1233_s6 = scalar_select %p984_p12, 1, 0 }
  0x12   : > { %s993_s12 = scalar_lea.hbm %s1223_s0, %s687_s8  ;;  %s191_s13 = scalar_lea.vmem [#allocation2], %s672_s9 }
  0x13   : > { %s198_s14 = sshll.u32 %s191_s13, 4  ;;  %p997_p13 = pnand %p748_p10, %p969_p5  ;;  %s1001_s14 = int_to_ptr.vmem [resolvable:$true] %s198_s14 }
  0x14   : > { %s1003_s16 = scalar_lea.sflag [#allocation3], %s187_s7  ;;  %s793_s17 = scalar_lea.hbm %s993_s12, 2048 }
  0x15   : > { %p794_p0 = scmp.ne.s32.totalorder %s993_s12, %s793_s17  ;;  %p795_p1 = pneg %p997_p13 }
  0x16   : > { %s798_s26 = scalar_lea.hbm %s1223_s0, 4096  ;;  %p799_p4 = scmp.lt.u32.totalorder %s993_s12, %s1223_s0 }
  0x17   : > { %p796_p2 = pnand %p795_p1, %p794_p0  ;;  %p800_p5 = scmp.lt.u32.totalorder %s798_s26, %s793_s17 }
  0x18   : > { %p802_p8 = scmp.lt.u32.totalorder %s793_s17, %s993_s12 }
  0x19   : > { %p797_p3 = pneg %p796_p2  ;;  %p801_p7 = por %p800_p5, %p799_p4 }
  0x1b   : > { %p803_p10 = por %p802_p8, %p801_p7 }
  0x1d   : > { %p804_p9 = pnand %p803_p10, %p797_p3 }
  0x1f   : > { %807 = shalt.err (!%p804_p9)
}
  0x20   : > { %s808_s7 = scalar_lea.vmem %s1001_s14, 2048  ;;  %s891_s9 = smov [#allocation2]  }
  0x21   : > { %p809_p0 = scmp.ne.s32.totalorder %s1001_s14, %s808_s7  ;;  %s813_s10 = sshll.u32 %s891_s9, 4  ;;  %s814_s10 = int_to_ptr.vmem [resolvable:$false] %s813_s10 }
  0x22   : > { %s815_s11 = scalar_lea.vmem %s814_s10, 4096  ;;  %p816_p11 = scmp.lt.s32.totalorder %s1001_s14, %s814_s10 }
  0x23   : > { %p811_p2 = pnand %p809_p0, %p795_p1  ;;  %p817_p4 = scmp.lt.s32.totalorder %s815_s11, %s808_s7 }
  0x25   : > { %p812_p12 = pneg %p811_p2  ;;  %p818_p5 = por %p817_p4, %p816_p11 }
  0x27   : > { %p819_p7 = pnand %p818_p5, %p812_p12 }
  0x29   : > { %822 = shalt.err (!%p819_p7)
}
  0x2a   : > { %s892_s13 = smov 256   ;;  %s893_s17 = smov 16  }
  0x2b   : > { %743 = dma.hbm_to_vmem [thread:$0]  (!%p997_p13), %s993_s12, 2048, %s1001_s14, %s1003_s16, %s892_s13, %s892_s13, %s893_s17  }
  0x2c   : > { %p675_p9 = scmp.ge.s32.totalorder %s889_s21, 1  ;;  %p206_p1 = scmp.lt.s32.totalorder %s889_s21, 3 }
  0x2e   : > { %p207_p3 = pnand %p675_p9, %p206_p1 }
  0x2f   : > { %s1034_s23 = sand.u32 (!%p207_p3), 1, %s881_s19  }
  0x30   : > { %210 = sbr.rel (%p207_p3) target bundleno = 823 (0x337), region = 40  ;;  %s676_s25 = sshll.u32 (!%p207_p3), %s1034_s23, 7 }
  0x31   : > { %s213_s26 = scalar_lea.sflag (!%p207_p3), [#allocation3], %s1034_s23  ;;  %s216_s28 = scalar_lea.vmem (!%p207_p3), [#allocation2], %s676_s25 }
  0x37   : > { %868 = dma.done.wait (%p973_p6), %s213_s26, 2048  }
  0x38   : > { %870 = vsyncadd (%p973_p6), %s213_s26, 4294965248  ;;  %v1044_v0 = vld [vmem:[%s216_s28] sm:$0xff]  ;;  %v1046_v1 = vld [vmem:[%s216_s28 + $0x8] sm:$0xff]  ;;  %v894_v27 = vmov 0.0|0.0   ;;  %vm895_vm0 = vmmov 0   ;;  %v896_v37 = vmov 0.0   ;;  %v300_v38 = vlaneseq }
  0x39   : > { %v1048_v2 = vld [vmem:[%s216_s28 + $0x20] sm:$0xff]  ;;  %v259_v3 = vadd.f32 %v1046_v1, %v1044_v0  ;;  %v1052_v4 = vld [vmem:[%s216_s28 + $0x28] sm:$0xff]  ;;  %v1054_v5 = vld [vmem:[%s216_s28 + $0x10] sm:$0xff]  ;;  %724 = vmatprep.subr.bf16.mxu0 %v894_v27  ;;  %716 = vmatprep.mubr.msk.f32.mxu0 %vm895_vm0, %v896_v37  ;;  %vm311_vm1 = vcmask 130112   ;;  %vm318_vm2 = vcmask 195712   ;;  %vm325_vm3 = vcmask 261312  }
  0x3a   : > { %v1056_v6 = vld [vmem:[%s216_s28 + $0x18] sm:$0xff]  ;;  %v265_v7 = vadd.f32 %v1052_v4, %v1048_v2  ;;  %v1060_v8 = vld [vmem:[%s216_s28 + $0x30] sm:$0xff]  ;;  %v1068_v12 = vld [vmem:[%s216_s28 + $0x40] sm:$0xff]  ;;  %719 = vmatprep.subr.mxu1 %v896_v37  ;;  %721 = vmatprep.mubr.msk.f32.mxu1 %vm895_vm0, %v896_v37  ;;  %v301_v39 = vand.u32 127, %v300_v38  ;;  %v1116_v40 = vshrl.u32 %v300_v38, 7  ;;  %vm332_vm4 = vcmask 326912  }
  0x3b   : > { %v1062_v9 = vld [vmem:[%s216_s28 + $0x38] sm:$0xff]  ;;  %260 = vadd.xlane.f32.xlu0 %v259_v3  ;;  %v262_v10 = vadd.f32 %v1056_v6, %v1054_v5  ;;  %v1070_v13 = vld [vmem:[%s216_s28 + $0x48] sm:$0xff]  ;;  %v1072_v14 = vld [vmem:[%s216_s28 + $0x50] sm:$0xff]  ;;  %vm339_vm5 = vcmask 392512   ;;  %vm346_vm6 = vcmask 458112   ;;  %vm353_vm7 = vcmask 523712  }
  0x3c   : > { %266 = vadd.xlane.f32.xlu1 %v265_v7  ;;  %v268_v11 = vadd.f32 %v1062_v9, %v1060_v8  ;;  %v1074_v15 = vld [vmem:[%s216_s28 + $0x58] sm:$0xff]  ;;  %v271_v16 = vadd.f32 %v1070_v13, %v1068_v12  ;;  %v1080_v18 = vld [vmem:[%s216_s28 + $0x60] sm:$0xff]  ;;  %v1082_v19 = vld [vmem:[%s216_s28 + $0x68] sm:$0xff]  ;;  %v306_v41 = vadd.s32 4294967288, %v301_v39  ;;  %v313_v42 = vadd.s32 4294967280, %v301_v39  ;;  %s1142_s10 = scalar_lea.vmem [#allocation5], %s676_s25 }
  0x3d   : > { %v274_v17 = vadd.f32 %v1074_v15, %v1072_v14  ;;  %v1084_v20 = vld [vmem:[%s216_s28 + $0x70] sm:$0xff]  ;;  %v1086_v21 = vld [vmem:[%s216_s28 + $0x78] sm:$0xff]  ;;  %v277_v22 = vadd.f32 %v1082_v19, %v1080_v18  ;;  %v283_v24 = vld [vmem:[%s1224_s1] sm:$0xff]  ;;  %v320_v43 = vadd.s32 4294967272, %v301_v39  ;;  %v304_v45 = vsub.s32 %v301_v39, %v1116_v40  ;;  %s688_s25 = sshll.u32 %s951_s22, 11  ;;  %s596_s11 = sshll.u32 %s1142_s10, 4  ;;  %s1175_s11 = int_to_ptr.vmem [resolvable:$true] %s596_s11 }
  0x3e   : > { %v280_v23 = vadd.f32 %v1086_v21, %v1084_v20  ;;  %v284_v25 = vld [vmem:[%s1224_s1 + $0x8] sm:$0xff]  ;;  %v285_v28 = vld [vmem:[%s1224_s1 + $0x10] sm:$0xff]  ;;  %v286_v29 = vld [vmem:[%s1224_s1 + $0x18] sm:$0xff]  ;;  %v309_v47 = vsub.s32 %v306_v41, %v1116_v40  ;;  %v327_v48 = vadd.s32 4294967264, %v301_v39  ;;  %v316_v49 = vsub.s32 %v313_v42, %v1116_v40  ;;  %s1173_s26 = scalar_lea.hbm %s1228_s5, %s688_s25  ;;  %s583_s22 = scalar_lea.sflag [#allocation4], %s1034_s23 }
  0x3f   : > { %263 = vadd.xlane.f32.xlu0 %v262_v10  ;;  %v725_v26 = vpack.c.bf16 %v284_v25, %v283_v24  ;;  %v728_v30 = vpack.c.bf16 %v286_v29, %v285_v28  ;;  %v287_v31 = vld [vmem:[%s1224_s1 + $0x20] sm:$0xff]  ;;  %v288_v32 = vld [vmem:[%s1224_s1 + $0x28] sm:$0xff]  ;;  %v289_v34 = vld [vmem:[%s1224_s1 + $0x30] sm:$0xff]  ;;  %v323_v50 = vsub.s32 %v320_v43, %v1116_v40  ;;  %v334_v51 = vadd.s32 4294967256, %v301_v39  ;;  %s823_s28 = scalar_lea.vmem %s1175_s11, 2048  ;;  %p1235_p11 = scmp.ne.s32.totalorder %s1232_s30, 0 }
  0x40   : > { %269 = vadd.xlane.f32.xlu1 %v268_v11  ;;  %v731_v33 = vpack.c.bf16 %v288_v32, %v287_v31  ;;  %v290_v35 = vld [vmem:[%s1224_s1 + $0x38] sm:$0xff]  ;;  %v330_v56 = vsub.s32 %v327_v48, %v1116_v40  ;;  %v341_v57 = vadd.s32 4294967248, %v301_v39  ;;  %v348_v61 = vadd.s32 4294967240, %v301_v39  ;;  %v429_v31 = vld [vmem:[%s1226_s3] sm:$0xf]  ;;  %p824_p6 = scmp.ne.s32.totalorder %s1175_s11, %s823_s28  ;;  %s897_s29 = smov [#allocation5]  }
  0x41   : > { %726 = vmatpush3.bf16.msra.mxu0 %v725_v26  ;;  %v734_v36 = vpack.c.bf16 %v290_v35, %v289_v34  ;;  %v337_v60 = vsub.s32 %v334_v51, %v1116_v40  ;;  %vm355_vm8 = vcmask 523264   ;;  %vm435_vm9 = vcmask 1043456   ;;  %v291_v32 = vld [vmem:[%s1225_s2] sm:$0x1]  ;;  %s827_s12 = sshll.u32 %s897_s29, 4  ;;  %s828_s12 = int_to_ptr.vmem [resolvable:$false] %s827_s12 }
  0x42   : > { %727 = vmatprep.subr.bf16.mxu0 %v894_v27  ;;  %720 = vmatpush3.msk.msra.mxu1 %vm435_vm9, %v429_v31  ;;  %vm431_vm10 = vcmask 31744   ;;  %v430_v37 = vld [vmem:[%s1227_s4] sm:$0x1]  ;;  %p825_p12 = pnand %p824_p6, %p1235_p11  ;;  %s829_s14 = scalar_lea.vmem %s828_s12, 4096 }
  0x43   : > { %272 = vadd.xlane.f32.xlu0 %v271_v16  ;;  %v344_v16 = vsub.s32 %v341_v57, %v1116_v40  ;;  %p830_p8 = scmp.lt.s32.totalorder %s1175_s11, %s828_s12  ;;  %p831_p10 = scmp.lt.s32.totalorder %s829_s14, %s823_s28 }
  0x44   : > { %275 = vadd.xlane.f32.xlu1 %v274_v17  ;;  %p826_p13 = pneg %p825_p12 }
  0x45   : > { %729 = vmatpush3.bf16.msra.mxu0 %v728_v30  ;;  %p832_p0 = por %p831_p10, %p830_p8 }
  0x46   : > { %730 = vmatprep.subr.bf16.mxu0 %v894_v27 }
  0x47   : > { %278 = vadd.xlane.f32.xlu0 %v277_v22  ;;  %v351_v22 = vsub.s32 %v348_v61, %v1116_v40  ;;  %p833_p2 = pnand %p832_p0, %p826_p13 }
  0x48   : > { %281 = vadd.xlane.f32.xlu1 %v280_v23 }
  0x49   : > { %732 = vmatpush3.bf16.msra.mxu0 %v731_v33 }
  0x4a   : > { %733 = vmatprep.subr.bf16.mxu0 %v894_v27 }
  0x4d   : > { %735 = vmatpush3.bf16.msra.mxu0 %v734_v36 }
  0xc8   : > { %v261_v44 = vpop.xlane.xlu0 %260 }
  0xc9   : > { %v267_v46 = vpop.xlane.xlu1 %266  ;;  %v305_v53 = vrot.slane %v261_v44, %v304_v45  ;;  %v517_v45 = vsub.s32 0, %v1116_v40 }
  0xca   : > { %v317_v58 = vrot.slane %v267_v46, %v316_v49 }
  0xcc   : > { %v264_v52 = vpop.xlane.xlu0 %263 }
  0xcd   : > { %v310_v54 = vrot.slane %v264_v52, %v309_v47  ;;  %v270_v55 = vpop.xlane.xlu1 %269 }
  0xce   : > { %v324_v59 = vrot.slane %v270_v55, %v323_v50 }
  0xcf   : > { %v312_v62 = vsel %vm311_vm1, %v310_v54, %v305_v53 }
  0xd0   : > { %v319_v63 = vsel %vm318_vm2, %v317_v58, %v312_v62  ;;  %v273_v3 = vpop.xlane.xlu0 %272 }
  0xd1   : > { %v326_v7 = vsel %vm325_vm3, %v324_v59, %v319_v63  ;;  %v331_v10 = vrot.slane %v273_v3, %v330_v56  ;;  %v276_v11 = vpop.xlane.xlu1 %275 }
  0xd2   : > { %v338_v17 = vrot.slane %v276_v11, %v337_v60 }
  0xd3   : > { %v333_v23 = vsel %vm332_vm4, %v331_v10, %v326_v7 }
  0xd4   : > { %v279_v24 = vpop.xlane.xlu0 %278  ;;  %v340_v27 = vsel %vm339_vm5, %v338_v17, %v333_v23 }
  0xd5   : > { %v345_v25 = vrot.slane %v279_v24, %v344_v16  ;;  %v282_v26 = vpop.xlane.xlu1 %281 }
  0xd6   : > { %v352_v28 = vrot.slane %v282_v26, %v351_v22 }
  0xd7   : > { %v347_v29 = vsel %vm346_vm6, %v345_v25, %v340_v27 }
  0xd8   : > { %v354_v30 = vsel %vm353_vm7, %v352_v28, %v347_v29 }
  0xd9   : > { %717 = vmatmul.mubr.msk.f32.vlgmr.msra.gmra.mrb[0].mxu0 %vm355_vm8, %v354_v30 }
 0x1ac   : > { %v424_v33 = vpop.f32.mrb[0].mxu0 }
 0x1ad   : > { %v425_v34 = vadd.f32 %v424_v33, %v291_v32  ;;  %v718_v35 = vpop.f32.mrb[1].mxu0 }
 0x1af   : > { %v428_v36 = vmax.f32 %v425_v34, 0.0 }
 0x1b1   : > { %722 = vmatmul.mubr.msk.f32.vlgmr.msra.gmra.mrb[0].mxu1 %vm431_vm10, %v428_v36 }
 0x284   : > { %v505_v38 = vpop.f32.mrb[0].mxu1 }
 0x285   : > { %v506_v39 = vadd.f32 %v505_v38, %v430_v37  ;;  %v723_v41 = vpop.f32.mrb[1].mxu1 }
 0x287   : > { %v681_v42 = vmul.f32 -1.442695, %v506_v39 }
 0x289   : > { %789 = vpow2.f32 %v681_v42 }
 0x293   : > { %v790_v43 = vpop.eup %789 }
 0x294   : > { %v512_v44 = vadd.f32 1.0, %v790_v43 }
 0x296   : > { %791 = vrcp.f32 %v512_v44 }
 0x2a0   : > { %v792_v46 = vpop.eup %791 }
 0x2a1   : > { %v518_v47 = vrot.slane %v792_v46, %v517_v45 }
 0x2a3   : > { %524 = vbcast.lane.b32.xlu1 %v518_v47, 264  ;;  %520 = vbcast.lane.b32.xlu0 %v518_v47, 256 }
 0x2a7   : > { %528 = vbcast.lane.b32.xlu1 %v518_v47, 272  ;;  %536 = vbcast.lane.b32.xlu0 %v518_v47, 288 }
 0x2ab   : > { %532 = vbcast.lane.b32.xlu1 %v518_v47, 280  ;;  %544 = vbcast.lane.b32.xlu0 %v518_v47, 304 }
 0x2af   : > { %540 = vbcast.lane.b32.xlu1 %v518_v47, 296 }
 0x2b3   : > { %548 = vbcast.lane.b32.xlu1 %v518_v47, 312 }
 0x315   : > { %v525_v48 = vpop.permute.xlu1 %524  ;;  %v521_v49 = vpop.permute.xlu0 %520 }
 0x316   : > { %v552_v50 = vmul.f32 %v525_v48, %v1054_v5  ;;  %v553_v51 = vmul.f32 %v525_v48, %v1056_v6  ;;  %v550_v52 = vmul.f32 %v521_v49, %v1044_v0  ;;  %v551_v40 = vmul.f32 %v521_v49, %v1046_v1 }
 0x318   : > { %568 = vst [vmem:[%s1142_s10 + $0x10] sm:$0xff] %v552_v50  ;;  %569 = vst [vmem:[%s1142_s10 + $0x18] sm:$0xff] %v553_v51 }
 0x319   : > { %566 = vst [vmem:[%s1142_s10] sm:$0xff] %v550_v52  ;;  %567 = vst [vmem:[%s1142_s10 + $0x8] sm:$0xff] %v551_v40  ;;  %v529_v5 = vpop.permute.xlu1 %528  ;;  %v537_v0 = vpop.permute.xlu0 %536 }
 0x31a   : > { %v554_v1 = vmul.f32 %v529_v5, %v1048_v2  ;;  %v555_v6 = vmul.f32 %v529_v5, %v1052_v4  ;;  %v558_v53 = vmul.f32 %v537_v0, %v1068_v12  ;;  %v559_v54 = vmul.f32 %v537_v0, %v1070_v13 }
 0x31c   : > { %570 = vst [vmem:[%s1142_s10 + $0x20] sm:$0xff] %v554_v1  ;;  %571 = vst [vmem:[%s1142_s10 + $0x28] sm:$0xff] %v555_v6 }
 0x31d   : > { %574 = vst [vmem:[%s1142_s10 + $0x40] sm:$0xff] %v558_v53  ;;  %575 = vst [vmem:[%s1142_s10 + $0x48] sm:$0xff] %v559_v54  ;;  %v533_v55 = vpop.permute.xlu1 %532  ;;  %v545_v56 = vpop.permute.xlu0 %544 }
 0x31e   : > { %v556_v2 = vmul.f32 %v533_v55, %v1060_v8  ;;  %v557_v57 = vmul.f32 %v533_v55, %v1062_v9  ;;  %v562_v4 = vmul.f32 %v545_v56, %v1080_v18  ;;  %v563_v12 = vmul.f32 %v545_v56, %v1082_v19 }
 0x320   : > { %572 = vst [vmem:[%s1142_s10 + $0x30] sm:$0xff] %v556_v2  ;;  %573 = vst [vmem:[%s1142_s10 + $0x38] sm:$0xff] %v557_v57 }
 0x321   : > { %578 = vst [vmem:[%s1142_s10 + $0x60] sm:$0xff] %v562_v4  ;;  %579 = vst [vmem:[%s1142_s10 + $0x68] sm:$0xff] %v563_v12  ;;  %v541_v13 = vpop.permute.xlu1 %540 }
 0x322   : > { %v560_v58 = vmul.f32 %v541_v13, %v1072_v14  ;;  %v561_v59 = vmul.f32 %v541_v13, %v1074_v15 }
 0x324   : > { %576 = vst [vmem:[%s1142_s10 + $0x50] sm:$0xff] %v560_v58  ;;  %577 = vst [vmem:[%s1142_s10 + $0x58] sm:$0xff] %v561_v59 }
 0x325   : > { %v549_v8 = vpop.permute.xlu1 %548 }
 0x326   : > { %v564_v9 = vmul.f32 %v549_v8, %v1084_v20  ;;  %v565_v14 = vmul.f32 %v549_v8, %v1086_v21 }
 0x328   : > { %580 = vst [vmem:[%s1142_s10 + $0x70] sm:$0xff] %v564_v9  ;;  %581 = vst [vmem:[%s1142_s10 + $0x78] sm:$0xff] %v565_v14 }
 0x329   : > { %836 = shalt.err (!%p833_p2)
}
 0x32a   : > { %s837_s15 = scalar_lea.hbm %s1173_s26, 2048  ;;  %s841_s7 = scalar_lea.hbm %s1228_s5, 4096 }
 0x32b   : > { %p838_p4 = scmp.ne.s32.totalorder %s1173_s26, %s837_s15  ;;  %p842_p9 = scmp.lt.u32.totalorder %s1173_s26, %s1228_s5 }
 0x32c   : > { %p843_p1 = scmp.lt.u32.totalorder %s841_s7, %s837_s15  ;;  %p845_p6 = scmp.lt.u32.totalorder %s837_s15, %s1173_s26 }
 0x32d   : > { %p839_p5 = pnand %p838_p4, %p1235_p11 }
 0x32e   : > { %p844_p3 = por %p843_p1, %p842_p9 }
 0x32f   : > { %p840_p7 = pneg %p839_p5 }
 0x330   : > { %p846_p12 = por %p845_p6, %p844_p3 }
 0x332   : > { %p847_p13 = pnand %p846_p12, %p840_p7 }
 0x334   : > { %850 = shalt.err (!%p847_p13)
}
 0x335   : > { %s898_s25 = smov 256   ;;  %s899_s13 = smov 16  }
 0x336   : > { %738 = dma.vmem_to_hbm [thread:$0]  (%p1235_p11), %s1175_s11, 2048, %s1173_s26, %s583_s22, %s898_s25, %s898_s25, %s899_s13  }
 0x337 PF: > { %s611_s17 = sand.u32 1, %s877_s18   ;;  %p1236_p8 = scmp.ne.s32.totalorder %s1233_s6, 0 }
 0x338   : > { %p1237_p10 = scmp.ge.s32.totalorder %s889_s21, 2  ;;  %s612_s28 = scalar_lea.sflag [#allocation4], %s611_s17 }
 0x33a   : > { %p745_p0 = pnand %p1237_p10, %p1236_p8 }
 0x33c   : > { %872 = dma.done.wait (!%p745_p0), %s612_s28, 2048  }
 0x33d   : > { %874 = vsyncadd (!%p745_p0), %s612_s28, 4294965248  ;;  %p18_p2 = scmp.ge.s32.totalorder %s955_s24, 4   ;;  %s1238_s18 = smov %s881_s19 }
 0x33e   : > { %s1239_s19 = smov %s885_s20  ;;  %s1240_s20 = smov %s967_s27 }
 0x33f   : > { %s1241_s21 = smov %s955_s24  ;;  %20 = sbr.rel (!%p18_p2) target bundleno = 5 (0x5), region = 85 }
 0x346   :  { %617 = vsyncpa [#allocation3], 1 }
 0x347   :  { %619 = vsyncpa [#allocation3 + $0x1], 1 }
 0x348   :  { %620 = vsyncpa [#allocation4], 1 }
 0x349   :  { %622 = vsyncpa [#allocation4 + $0x1], 1 }

</bundles_post_ra>
